<compile_context>
chip_gen: v5e
topology: v5e:2x2
jax: 0.10.0
libtpu: 0.0.40
codegen_flags: <defaults>
</compile_context>

<pallas_src>
import functools

import jax
import jax.numpy as jnp
from jax.experimental import pallas as pl
from jax.experimental.pallas import tpu as pltpu


def _round_up(x, m):
    return ((x + m - 1) // m) * m


# ---------------------------------------------------------------------------
# Kernel 1: input_proj -- 1x1 conv as a matmul over channels, NCHW layout kept
# ---------------------------------------------------------------------------
def _input_proj_kernel(src_ref, w_ref, b_ref, out_ref):
    # src_ref : [1, C, hw_t]  f32   (cast to bf16 in VMEM -> no wrapper cast copy)
    # w_ref   : [D, C]        bf16  (full-array block, resident across grid)
    # b_ref   : [D, 1]        f32
    # out_ref : [1, D, hw_t]  bf16  (halved writeback stream)
    x = src_ref[0].astype(jnp.bfloat16)                                # [C, hw_t]
    acc = jnp.dot(w_ref[...], x, preferred_element_type=jnp.float32)   # [D, hw_t]
    out_ref[0] = (acc + b_ref[...]).astype(out_ref.dtype)


def _pick_hw_tile(C, D, HW, B):
    """Spatial tile width: as wide as a ~24 MiB VMEM budget allows
    (double-buffered f32 src tile + bf16 out tile), capped at 2048 lanes,
    and -- when B == 1 -- split so the grid keeps >= 2 roughly-equal parallel
    steps for the two v7x TensorCores."""
    HW_r = _round_up(HW, 128)
    budget = 24 << 20
    per_lane = 2 * (C * 4 + D * 2)            # 2 pipeline buffers per tile
    hw_cap = max(128, (budget // per_lane) // 128 * 128)
    hw_t = min(2048, HW_r, hw_cap)
    if B == 1:
        hw_t = min(hw_t, max(128, _round_up(pl.cdiv(HW_r, 2), 128)))
    return hw_t


def input_proj_pallas(src, w, b):
    """1x1 conv: src [B, C, H, W] (f32) -> [B, D, H, W] (bf16)."""
    B, C, H, W = src.shape
    D = w.shape[0]
    HW = H * W
    hw_t = _pick_hw_tile(C, D, HW, B)

    # No wrapper-side cast or pad: the kernel reads f32 directly, Pallas masks
    # the (possible) partial edge block, and padded columns are never stored.
    src_flat = src.reshape(B, C, HW)

    out = pl.pallas_call(
        _input_proj_kernel,
        out_shape=jax.ShapeDtypeStruct((B, D, HW), jnp.bfloat16),
        grid=(B, pl.cdiv(HW, hw_t)),
        in_specs=[
            pl.BlockSpec((1, C, hw_t), lambda bi, j: (bi, 0, j)),
            # Constant-index blocks: weights/bias stay VMEM-resident across the
            # grid.  (pl.Buffered(1) would drop the dead 2nd buffer if VMEM
            # ever got tight; not needed at these sizes.)
            pl.BlockSpec((D, C), lambda bi, j: (0, 0)),
            pl.BlockSpec((D, 1), lambda bi, j: (0, 0)),
        ],
        out_specs=pl.BlockSpec((1, D, hw_t), lambda bi, j: (bi, 0, j)),
        compiler_params=pltpu.CompilerParams(
            dimension_semantics=("parallel", "parallel"),
            vmem_limit_bytes=48 << 20),
    )(src_flat, w.astype(jnp.bfloat16), b.astype(jnp.float32).reshape(D, 1))

    return out.reshape(B, D, H, W)


# ---------------------------------------------------------------------------
# Kernel 2: fused class_embed + bbox_embed (3-layer MLP + sigmoid)
# ---------------------------------------------------------------------------
def _heads_kernel(hs_ref, wcat_ref, bc_ref, b1_ref, w2_ref, b2_ref,
                  w3_ref, b3_ref, logits_ref, boxes_ref, *, nc_pad):
    x = hs_ref[...].astype(jnp.bfloat16)                               # [tm, D]

    # class logits and the first bbox layer share x: one fused 256-wide MXU
    # pass (v6e/v7x MXU is 256 wide), split at the 128-lane boundary.
    h01 = jnp.dot(x, wcat_ref[...], preferred_element_type=jnp.float32)
    n_cls = logits_ref.shape[-1]
    logits_ref[...] = (h01[:, :n_cls] + bc_ref[...]).astype(logits_ref.dtype)

    # bbox MLP: (Linear -> ReLU) x2 -> Linear -> sigmoid, all on-chip.
    h = jnp.maximum(h01[:, nc_pad:] + b1_ref[...], 0.0).astype(x.dtype)
    h = jnp.dot(h, w2_ref[...], preferred_element_type=jnp.float32) + b2_ref[...]
    h = jnp.maximum(h, 0.0).astype(x.dtype)
    h = jnp.dot(h, w3_ref[...], preferred_element_type=jnp.float32) + b3_ref[...]
    # sigmoid with the divide on the EUP slot (exp already lives there)
    boxes_ref[...] = pl.reciprocal(1.0 + jnp.exp(-h),
                                   approx=True).astype(boxes_ref.dtype)


def heads_pallas(hs, class_w, class_b, w1, b1, w2, b2, w3, b3):
    """hs [L, B, Q, D] (f32) -> (logits [L,B,Q,n_cls], boxes [L,B,Q,4]), f32."""
    L, B, Q, D = hs.shape
    M = L * B * Q
    n_cls = class_w.shape[1]
    n_box = w3.shape[1]
    NC_pad = _round_up(n_cls, 128)

    # Row tile: cap at 512 but keep >= 2 roughly-equal parallel grid steps so
    # both v7x TensorCores get work (harmless on 1-TC v5e/v6e).
    n_steps = max(2, pl.cdiv(M, 512))
    tm = min(_round_up(pl.cdiv(M, n_steps), 8), _round_up(M, 8))
    grid = (pl.cdiv(M, tm),)

    # No wrapper-side cast or pad of hs; a partial edge block (if any) is
    # masked on store, so garbage rows never reach the outputs.
    x = hs.reshape(M, D)

    # class_w (lane-padded to the 128 boundary) and bbox_w1 fused into one
    # [D, 128 + D] bf16 weight that stays VMEM-resident.
    wcat = jnp.concatenate(
        [jnp.pad(class_w, ((0, 0), (0, NC_pad - n_cls))), w1],
        axis=1).astype(jnp.bfloat16)
    bc = class_b.astype(jnp.float32).reshape(1, n_cls)
    b1_p = b1.astype(jnp.float32).reshape(1, D)
    w2_p = w2.astype(jnp.bfloat16)
    b2_p = b2.astype(jnp.float32).reshape(1, D)
    w3_p = w3.astype(jnp.bfloat16)
    b3_p = b3.astype(jnp.float32).reshape(1, n_box)

    def full(shape):
        # Full-array block: weights/biases stay VMEM-resident across the grid.
        return pl.BlockSpec(shape, lambda i: (0,) * len(shape))

    logits, boxes = pl.pallas_call(
        functools.partial(_heads_kernel, nc_pad=NC_pad),
        out_shape=(
            jax.ShapeDtypeStruct((M, n_cls), jnp.float32),
            jax.ShapeDtypeStruct((M, n_box), jnp.float32),
        ),
        grid=grid,
        in_specs=[
            pl.BlockSpec((tm, D), lambda i: (i, 0)),
            full((D, NC_pad + D)), full((1, n_cls)), full((1, D)),
            full((D, D)), full((1, D)),
            full((D, n_box)), full((1, n_box)),
        ],
        out_specs=(
            # True-width outputs (92 / 4 lanes): masked stores instead of
            # 128-padded slabs + wrapper slices -> no write amplification and
            # no post-kernel copies.
            pl.BlockSpec((tm, n_cls), lambda i: (i, 0)),
            pl.BlockSpec((tm, n_box), lambda i: (i, 0)),
        ),
        compiler_params=pltpu.CompilerParams(
            dimension_semantics=("parallel",),
            vmem_limit_bytes=48 << 20),
    )(x, wcat, bc, b1_p, w2_p, b2_p, w3_p, b3_p)

    return logits.reshape(L, B, Q, n_cls), boxes.reshape(L, B, Q, n_box)


# ---------------------------------------------------------------------------
# Deterministic stand-in for the DETR transformer (not defined in the spec)
# ---------------------------------------------------------------------------
def transformer_stub(memory, mask, query_embed, pos, num_decoder_layers):
    """memory [B,D,HW], mask [B,HW] (True=padded), query_embed [Q,D], pos [B,D,HW]
    -> hs [num_decoder_layers, B, Q, D] (float32)."""
    # TODO(synk): real DETR transformer (multi-head enc/dec attention) is not
    # reproducible from the given code -- deterministic masked-pooling stub.
    valid = jnp.where(mask, 0.0, 1.0)[:, None, :]                  # [B, 1, HW]
    denom = jnp.maximum(valid.sum(axis=-1), 1.0)                   # [B, 1]
    pooled = ((memory.astype(jnp.float32) + pos) * valid).sum(axis=-1) / denom
    base = jnp.tanh(query_embed[None, :, :] + pooled[:, None, :])  # [B, Q, D]
    layers = [jnp.tanh(base * (1.0 + 0.25 * l)) for l in range(num_decoder_layers)]
    return jnp.stack(layers, axis=0)


# ---------------------------------------------------------------------------
# Forward pass (aux_loss=False path of DETR_origin.forward)
# ---------------------------------------------------------------------------
def detr_forward(params, src, mask, pos, *, num_decoder_layers):
    B, C, H, W = src.shape
    D = params["input_proj_w"].shape[0]

    proj = input_proj_pallas(src, params["input_proj_w"], params["input_proj_b"])
    hs = transformer_stub(proj.reshape(B, D, H * W),
                          mask.reshape(B, H * W),
                          params["query_embed"],
                          pos.reshape(B, D, H * W),
                          num_decoder_layers)
    logits, boxes = heads_pallas(
        hs,
        params["class_w"], params["class_b"],
        params["bbox_w1"], params["bbox_b1"],
        params["bbox_w2"], params["bbox_b2"],
        params["bbox_w3"], params["bbox_b3"])
    # DETR returns only the last decoder layer (aux_loss=False).
    return {"pred_logits": logits[-1], "pred_boxes": boxes[-1]}


def make_params(key, c_in, hidden_dim, num_classes, num_queries):
    ks = jax.random.split(key, 10)

    def lin(k, n_in, n_out):
        return jax.random.normal(k, (n_in, n_out), jnp.float32) / jnp.sqrt(n_in)

    return {
        "input_proj_w": jax.random.normal(ks[0], (hidden_dim, c_in), jnp.float32)
                        / jnp.sqrt(c_in),
        "input_proj_b": 0.01 * jax.random.normal(ks[1], (hidden_dim,), jnp.float32),
        "class_w": lin(ks[2], hidden_dim, num_classes + 1),
        "class_b": 0.01 * jax.random.normal(ks[3], (num_classes + 1,), jnp.float32),
        "bbox_w1": lin(ks[4], hidden_dim, hidden_dim),
        "bbox_b1": 0.01 * jax.random.normal(ks[5], (hidden_dim,), jnp.float32),
        "bbox_w2": lin(ks[6], hidden_dim, hidden_dim),
        "bbox_b2": 0.01 * jax.random.normal(ks[7], (hidden_dim,), jnp.float32),
        "bbox_w3": lin(ks[8], hidden_dim, 4),
        "bbox_b3": 0.01 * jax.random.normal(ks[9], (4,), jnp.float32),
        "query_embed": 0.1 * jax.random.normal(jax.random.fold_in(key, 123),
                                               (num_queries, hidden_dim),
                                               jnp.float32),
    }


def _heads_ref(hs, p):
    """Pure-JAX reference of the fused head kernel (same bf16 casts)."""
    L, B, Q, D = hs.shape
    x = hs.reshape(-1, D).astype(jnp.bfloat16)
    logits = jnp.dot(x, p["class_w"].astype(jnp.bfloat16),
                     preferred_element_type=jnp.float32) + p["class_b"]
    h = jnp.dot(x, p["bbox_w1"].astype(jnp.bfloat16),
                preferred_element_type=jnp.float32) + p["bbox_b1"]
    h = jnp.maximum(h, 0.0).astype(jnp.bfloat16)
    h = jnp.dot(h, p["bbox_w2"].astype(jnp.bfloat16),
                preferred_element_type=jnp.float32) + p["bbox_b2"]
    h = jnp.maximum(h, 0.0).astype(jnp.bfloat16)
    h = jnp.dot(h, p["bbox_w3"].astype(jnp.bfloat16),
                preferred_element_type=jnp.float32) + p["bbox_b3"]
    boxes = jax.nn.sigmoid(h)
    return logits.reshape(L, B, Q, -1), boxes.reshape(L, B, Q, -1)


if __name__ == "__main__":
    # Small shapes consistent with the module (hidden_dim multiple of 128,
    # H*W multiple of 128 so stores are lane-dense without padding).
    B, C_IN, H, W = 2, 64, 8, 16
    HIDDEN, NUM_QUERIES, NUM_CLASSES, NUM_DEC_LAYERS = 128, 16, 91, 2

    key = jax.random.PRNGKey(0)
    k_src, k_pos, k_par = jax.random.split(key, 3)
    src = jax.random.normal(k_src, (B, C_IN, H, W), jnp.float32)
    pos = 0.1 * jax.random.normal(k_pos, (B, HIDDEN, H, W), jnp.float32)
    mask = jnp.zeros((B, H, W), dtype=jnp.bool_)
    params = make_params(k_par, C_IN, HIDDEN, NUM_CLASSES, NUM_QUERIES)

    fwd = jax.jit(functools.partial(detr_forward,
                                    num_decoder_layers=NUM_DEC_LAYERS))
    out = fwd(params, src, mask, pos)
    jax.block_until_ready(out)

    assert out["pred_logits"].shape == (B, NUM_QUERIES, NUM_CLASSES + 1)
    assert out["pred_boxes"].shape == (B, NUM_QUERIES, 4)
    assert bool(jnp.all(jnp.isfinite(out["pred_logits"])))
    assert bool(jnp.all(jnp.isfinite(out["pred_boxes"])))
    eps = 1e-3  # approx-reciprocal sigmoid can overshoot by <~2.5e-4
    assert bool(jnp.all((out["pred_boxes"] >= -eps)
                        & (out["pred_boxes"] <= 1.0 + eps)))

    # Loose bf16-level checks of each Pallas piece against pure-JAX references.
    proj = input_proj_pallas(src, params["input_proj_w"], params["input_proj_b"])
    proj_ref = (jnp.einsum(
        "dc,bchw->bdhw",
        params["input_proj_w"].astype(jnp.bfloat16),
        src.astype(jnp.bfloat16),
        preferred_element_type=jnp.float32,
    ) + params["input_proj_b"][None, :, None, None]).astype(jnp.bfloat16)
    assert bool(jnp.allclose(proj.astype(jnp.float32),
                             proj_ref.astype(jnp.float32),
                             atol=5e-2, rtol=5e-2))

    hs = transformer_stub(proj.reshape(B, HIDDEN, H * W), mask.reshape(B, H * W),
                          params["query_embed"], pos.reshape(B, HIDDEN, H * W),
                          NUM_DEC_LAYERS)
    logits, boxes = heads_pallas(hs, params["class_w"], params["class_b"],
                                 params["bbox_w1"], params["bbox_b1"],
                                 params["bbox_w2"], params["bbox_b2"],
                                 params["bbox_w3"], params["bbox_b3"])
    logits_ref, boxes_ref = _heads_ref(hs, params)
    assert bool(jnp.allclose(logits, logits_ref, atol=5e-2, rtol=5e-2))
    assert bool(jnp.allclose(boxes, boxes_ref, atol=5e-2, rtol=5e-2))

    print("KERNEL_OK")
</pallas_src>

<mosaic_0001>
module attributes {stable_mosaic.version = 11 : i64} {
  func.func @_input_proj_kernel(%arg0: i32, %arg1: i32, %arg2: memref<1x64x128xf32, #tpu.memory_space<vmem>>, %arg3: memref<128x64xbf16, #tpu.memory_space<vmem>>, %arg4: memref<128x1xf32, #tpu.memory_space<vmem>>, %arg5: memref<1x128x128xbf16, #tpu.memory_space<vmem>>) attributes {dimension_semantics = [#tpu.dimension_semantics<parallel>, #tpu.dimension_semantics<parallel>], iteration_bounds = array<i64: 2, 1>, scalar_prefetch = 0 : i64, scratch_operands = 0 : i64, tpu.core_type = #tpu.core_type<tc>, window_params = [{transform_indices = @transform_0, window_bounds = array<i64: 1, 64, 128>}, {pipeline_mode = #tpu.pipeline_mode<synchronous>, transform_indices = @transform_1, window_bounds = array<i64: 128, 64>}, {pipeline_mode = #tpu.pipeline_mode<synchronous>, transform_indices = @transform_2, window_bounds = array<i64: 128, 1>}, {transform_indices = @transform_3, window_bounds = array<i64: 1, 128, 128>}]} {
    %c0 = arith.constant 0 : index
    %c0_0 = arith.constant 0 : index
    %c0_1 = arith.constant 0 : index
    %0 = vector.load %arg2[%c0, %c0_0, %c0_1] : memref<1x64x128xf32, #tpu.memory_space<vmem>>, vector<1x64x128xf32>
    %1 = vector.shape_cast %0 : vector<1x64x128xf32> to vector<64x128xf32>
    %2 = arith.truncf %1 : vector<64x128xf32> to vector<64x128xbf16>
    %c0_2 = arith.constant 0 : index
    %c0_3 = arith.constant 0 : index
    %3 = vector.load %arg3[%c0_2, %c0_3] : memref<128x64xbf16, #tpu.memory_space<vmem>>, vector<128x64xbf16>
    %cst = arith.constant dense<0.000000e+00> : vector<128x128xf32>
    %4 = tpu.matmul %3, %2, %cst {dimension_numbers = #tpu.dot_dimension_numbers<[1], [0], [0], [1], [0, 0, 1, 1], [], []>} : vector<128x64xbf16>, vector<64x128xbf16>, vector<128x128xf32> -> vector<128x128xf32>
    %c0_4 = arith.constant 0 : index
    %c0_5 = arith.constant 0 : index
    %5 = vector.load %arg4[%c0_4, %c0_5] : memref<128x1xf32, #tpu.memory_space<vmem>>, vector<128x1xf32>
    %6 = vector.broadcast %5 : vector<128x1xf32> to vector<128x128xf32>
    %7 = arith.addf %4, %6 : vector<128x128xf32>
    %8 = arith.truncf %7 : vector<128x128xf32> to vector<128x128xbf16>
    %c0_6 = arith.constant 0 : index
    %c0_7 = arith.constant 0 : index
    %c0_8 = arith.constant 0 : index
    %9 = vector.load %arg5[%c0_6, %c0_7, %c0_8] : memref<1x128x128xbf16, #tpu.memory_space<vmem>>, vector<1x128x128xbf16>
    %10 = vector.shape_cast %9 : vector<1x128x128xbf16> to vector<128x128xbf16>
    %11 = vector.shape_cast %8 : vector<128x128xbf16> to vector<1x128x128xbf16>
    tpu.vector_store %arg5[%c0_6, %c0_7, %c0_8], %11 {strides = array<i32>} : memref<1x128x128xbf16, #tpu.memory_space<vmem>>, vector<1x128x128xbf16>,
    return
  }
  func.func @transform_0(%arg0: i32, %arg1: i32) -> (i32, i32, i32) {
    %c0_i32 = arith.constant 0 : i32
    %c0_i32_0 = arith.constant 0 : i32
    return %arg0, %c0_i32, %arg1 : i32, i32, i32
  }
  func.func @transform_1(%arg0: i32, %arg1: i32) -> (i32, i32) {
    %c0_i32 = arith.constant 0 : i32
    %c0_i32_0 = arith.constant 0 : i32
    %c0_i32_1 = arith.constant 0 : i32
    return %c0_i32, %c0_i32_0 : i32, i32
  }
  func.func @transform_2(%arg0: i32, %arg1: i32) -> (i32, i32) {
    %c0_i32 = arith.constant 0 : i32
    %c0_i32_0 = arith.constant 0 : i32
    %c0_i32_1 = arith.constant 0 : i32
    return %c0_i32, %c0_i32_0 : i32, i32
  }
  func.func @transform_3(%arg0: i32, %arg1: i32) -> (i32, i32, i32) {
    %c0_i32 = arith.constant 0 : i32
    %c0_i32_0 = arith.constant 0 : i32
    return %arg0, %c0_i32, %arg1 : i32, i32, i32
  }
}

module attributes {stable_mosaic.version = 11 : i64} {
  func.func @_heads_kernel(%arg0: i32, %arg1: memref<32x128xf32, #tpu.memory_space<vmem>>, %arg2: memref<128x256xbf16, #tpu.memory_space<vmem>>, %arg3: memref<1x92xf32, #tpu.memory_space<vmem>>, %arg4: memref<1x128xf32, #tpu.memory_space<vmem>>, %arg5: memref<128x128xbf16, #tpu.memory_space<vmem>>, %arg6: memref<1x128xf32, #tpu.memory_space<vmem>>, %arg7: memref<128x4xbf16, #tpu.memory_space<vmem>>, %arg8: memref<1x4xf32, #tpu.memory_space<vmem>>, %arg9: memref<32x92xf32, #tpu.memory_space<vmem>>, %arg10: memref<32x4xf32, #tpu.memory_space<vmem>>) attributes {dimension_semantics = [#tpu.dimension_semantics<parallel>], iteration_bounds = array<i64: 2>, scalar_prefetch = 0 : i64, scratch_operands = 0 : i64, tpu.core_type = #tpu.core_type<tc>, window_params = [{transform_indices = @transform_0, window_bounds = array<i64: 32, 128>}, {pipeline_mode = #tpu.pipeline_mode<synchronous>, transform_indices = @transform_1, window_bounds = array<i64: 128, 256>}, {pipeline_mode = #tpu.pipeline_mode<synchronous>, transform_indices = @transform_2, window_bounds = array<i64: 1, 92>}, {pipeline_mode = #tpu.pipeline_mode<synchronous>, transform_indices = @transform_3, window_bounds = array<i64: 1, 128>}, {pipeline_mode = #tpu.pipeline_mode<synchronous>, transform_indices = @transform_4, window_bounds = array<i64: 128, 128>}, {pipeline_mode = #tpu.pipeline_mode<synchronous>, transform_indices = @transform_5, window_bounds = array<i64: 1, 128>}, {pipeline_mode = #tpu.pipeline_mode<synchronous>, transform_indices = @transform_6, window_bounds = array<i64: 128, 4>}, {pipeline_mode = #tpu.pipeline_mode<synchronous>, transform_indices = @transform_7, window_bounds = array<i64: 1, 4>}, {transform_indices = @transform_8, window_bounds = array<i64: 32, 92>}, {transform_indices = @transform_9, window_bounds = array<i64: 32, 4>}]} {
    %c0 = arith.constant 0 : index
    %c0_0 = arith.constant 0 : index
    %0 = vector.load %arg1[%c0, %c0_0] : memref<32x128xf32, #tpu.memory_space<vmem>>, vector<32x128xf32>
    %1 = arith.truncf %0 : vector<32x128xf32> to vector<32x128xbf16>
    %c0_1 = arith.constant 0 : index
    %c0_2 = arith.constant 0 : index
    %2 = vector.load %arg2[%c0_1, %c0_2] : memref<128x256xbf16, #tpu.memory_space<vmem>>, vector<128x256xbf16>
    %cst = arith.constant dense<0.000000e+00> : vector<32x256xf32>
    %3 = tpu.matmul %1, %2, %cst {dimension_numbers = #tpu.dot_dimension_numbers<[1], [0], [0], [1], [0, 0, 1, 1], [], []>} : vector<32x128xbf16>, vector<128x256xbf16>, vector<32x256xf32> -> vector<32x256xf32>
    %4 = vector.extract_strided_slice %3 {offsets = [0, 0], sizes = [32, 92], strides = [1, 1]} : vector<32x256xf32> to vector<32x92xf32>
    %c0_3 = arith.constant 0 : index
    %c0_4 = arith.constant 0 : index
    %5 = vector.load %arg3[%c0_3, %c0_4] : memref<1x92xf32, #tpu.memory_space<vmem>>, vector<1x92xf32>
    %6 = vector.broadcast %5 : vector<1x92xf32> to vector<32x92xf32>
    %7 = arith.addf %4, %6 : vector<32x92xf32>
    %c0_5 = arith.constant 0 : index
    %c0_6 = arith.constant 0 : index
    %8 = vector.load %arg9[%c0_5, %c0_6] : memref<32x92xf32, #tpu.memory_space<vmem>>, vector<32x92xf32>
    tpu.vector_store %arg9[%c0_5, %c0_6], %7 {strides = array<i32>} : memref<32x92xf32, #tpu.memory_space<vmem>>, vector<32x92xf32>,
    %9 = vector.extract_strided_slice %3 {offsets = [0, 128], sizes = [32, 128], strides = [1, 1]} : vector<32x256xf32> to vector<32x128xf32>
    %c0_7 = arith.constant 0 : index
    %c0_8 = arith.constant 0 : index
    %10 = vector.load %arg4[%c0_7, %c0_8] : memref<1x128xf32, #tpu.memory_space<vmem>>, vector<1x128xf32>
    %11 = vector.broadcast %10 : vector<1x128xf32> to vector<32x128xf32>
    %12 = arith.addf %9, %11 : vector<32x128xf32>
    %cst_9 = arith.constant 0.000000e+00 : f32
    %13 = vector.broadcast %cst_9 : f32 to vector<32x128xf32>
    %14 = arith.maximumf %12, %13 : vector<32x128xf32>
    %15 = arith.truncf %14 : vector<32x128xf32> to vector<32x128xbf16>
    %c0_10 = arith.constant 0 : index
    %c0_11 = arith.constant 0 : index
    %16 = vector.load %arg5[%c0_10, %c0_11] : memref<128x128xbf16, #tpu.memory_space<vmem>>, vector<128x128xbf16>
    %cst_12 = arith.constant dense<0.000000e+00> : vector<32x128xf32>
    %17 = tpu.matmul %15, %16, %cst_12 {dimension_numbers = #tpu.dot_dimension_numbers<[1], [0], [0], [1], [0, 0, 1, 1], [], []>} : vector<32x128xbf16>, vector<128x128xbf16>, vector<32x128xf32> -> vector<32x128xf32>
    %c0_13 = arith.constant 0 : index
    %c0_14 = arith.constant 0 : index
    %18 = vector.load %arg6[%c0_13, %c0_14] : memref<1x128xf32, #tpu.memory_space<vmem>>, vector<1x128xf32>
    %19 = vector.broadcast %18 : vector<1x128xf32> to vector<32x128xf32>
    %20 = arith.addf %17, %19 : vector<32x128xf32>
    %cst_15 = arith.constant 0.000000e+00 : f32
    %21 = vector.broadcast %cst_15 : f32 to vector<32x128xf32>
    %22 = arith.maximumf %20, %21 : vector<32x128xf32>
    %23 = arith.truncf %22 : vector<32x128xf32> to vector<32x128xbf16>
    %c0_16 = arith.constant 0 : index
    %c0_17 = arith.constant 0 : index
    %24 = vector.load %arg7[%c0_16, %c0_17] : memref<128x4xbf16, #tpu.memory_space<vmem>>, vector<128x4xbf16>
    %cst_18 = arith.constant dense<0.000000e+00> : vector<32x4xf32>
    %25 = tpu.matmul %23, %24, %cst_18 {dimension_numbers = #tpu.dot_dimension_numbers<[1], [0], [0], [1], [0, 0, 1, 1], [], []>} : vector<32x128xbf16>, vector<128x4xbf16>, vector<32x4xf32> -> vector<32x4xf32>
    %c0_19 = arith.constant 0 : index
    %c0_20 = arith.constant 0 : index
    %26 = vector.load %arg8[%c0_19, %c0_20] : memref<1x4xf32, #tpu.memory_space<vmem>>, vector<1x4xf32>
    %27 = vector.broadcast %26 : vector<1x4xf32> to vector<32x4xf32>
    %28 = arith.addf %25, %27 : vector<32x4xf32>
    %cst_21 = arith.constant 0.000000e+00 : f32
    %29 = vector.broadcast %cst_21 : f32 to vector<32x4xf32>
    %30 = arith.subf %29, %28 : vector<32x4xf32>
    %31 = math.exp %30 : vector<32x4xf32>
    %cst_22 = arith.constant 1.000000e+00 : f32
    %32 = vector.broadcast %cst_22 : f32 to vector<32x4xf32>
    %33 = arith.addf %32, %31 : vector<32x4xf32>
    %34 = tpu.reciprocal %33 {approx = true} : vector<32x4xf32> -> vector<32x4xf32>
    %c0_23 = arith.constant 0 : index
    %c0_24 = arith.constant 0 : index
    %35 = vector.load %arg10[%c0_23, %c0_24] : memref<32x4xf32, #tpu.memory_space<vmem>>, vector<32x4xf32>
    tpu.vector_store %arg10[%c0_23, %c0_24], %34 {strides = array<i32>} : memref<32x4xf32, #tpu.memory_space<vmem>>, vector<32x4xf32>,
    return
  }
  func.func @transform_0(%arg0: i32) -> (i32, i32) {
    %c0_i32 = arith.constant 0 : i32
    %c0_i32_0 = arith.constant 0 : i32
    return %arg0, %c0_i32 : i32, i32
  }
  func.func @transform_1(%arg0: i32) -> (i32, i32) {
    %c0_i32 = arith.constant 0 : i32
    %c0_i32_0 = arith.constant 0 : i32
    %c0_i32_1 = arith.constant 0 : i32
    return %c0_i32, %c0_i32_0 : i32, i32
  }
  func.func @transform_2(%arg0: i32) -> (i32, i32) {
    %c0_i32 = arith.constant 0 : i32
    %c0_i32_0 = arith.constant 0 : i32
    %c0_i32_1 = arith.constant 0 : i32
    return %c0_i32, %c0_i32_0 : i32, i32
  }
  func.func @transform_3(%arg0: i32) -> (i32, i32) {
    %c0_i32 = arith.constant 0 : i32
    %c0_i32_0 = arith.constant 0 : i32
    %c0_i32_1 = arith.constant 0 : i32
    return %c0_i32, %c0_i32_0 : i32, i32
  }
  func.func @transform_4(%arg0: i32) -> (i32, i32) {
    %c0_i32 = arith.constant 0 : i32
    %c0_i32_0 = arith.constant 0 : i32
    %c0_i32_1 = arith.constant 0 : i32
    return %c0_i32, %c0_i32_0 : i32, i32
  }
  func.func @transform_5(%arg0: i32) -> (i32, i32) {
    %c0_i32 = arith.constant 0 : i32
    %c0_i32_0 = arith.constant 0 : i32
    %c0_i32_1 = arith.constant 0 : i32
    return %c0_i32, %c0_i32_0 : i32, i32
  }
  func.func @transform_6(%arg0: i32) -> (i32, i32) {
    %c0_i32 = arith.constant 0 : i32
    %c0_i32_0 = arith.constant 0 : i32
    %c0_i32_1 = arith.constant 0 : i32
    return %c0_i32, %c0_i32_0 : i32, i32
  }
  func.func @transform_7(%arg0: i32) -> (i32, i32) {
    %c0_i32 = arith.constant 0 : i32
    %c0_i32_0 = arith.constant 0 : i32
    %c0_i32_1 = arith.constant 0 : i32
    return %c0_i32, %c0_i32_0 : i32, i32
  }
  func.func @transform_8(%arg0: i32) -> (i32, i32) {
    %c0_i32 = arith.constant 0 : i32
    %c0_i32_0 = arith.constant 0 : i32
    return %arg0, %c0_i32 : i32, i32
  }
  func.func @transform_9(%arg0: i32) -> (i32, i32) {
    %c0_i32 = arith.constant 0 : i32
    %c0_i32_0 = arith.constant 0 : i32
    return %arg0, %c0_i32 : i32, i32
  }
}

</mosaic_0001>

<bundles_post_ra>
// kernel: detr_forward.2
= control target key start
LH: loop header
LB: loop body
LE: loop exit
PB: predicated region body
PF: predicated region fallthrough
CT: control target
= control target key end

     0   :  { %s749_s12 = smov 0   ;;  %s751_s13 = smov 0   ;;  %s879_s0 = inlined_call_operand.vmem [shape: f32[2,64,128], index: 0, kind: input, shape index: {}]   ;;  %s880_s1 = inlined_call_operand.vmem [shape: bf16[128,64], index: 1, kind: input, shape index: {}]   ;;  %s881_s2 = inlined_call_operand.vmem [shape: f32[128,1], index: 2, kind: input, shape index: {}]   ;;  %s882_s3 = inlined_call_operand.vmem [shape: bf16[2,128,128], index: 3, kind: output, shape index: {}]  }
   0x1   :  { %s753_s14 = smov 0  }
   0x2 LB: > { %s25_s15 = sadd.s32 1, %s722_s13  ;;  %p560_p0 = scmp.ge.s32.totalorder %s726_s14, 1  ;;  %s726_s14 = sphi %s753_s14, %s13_s14   ;;  %s722_s13 = sphi %s751_s13, %s884_s13   ;;  %s718_s12 = sphi %s749_s12, %s883_s12  }
   0x3   : > { %p27_p1 = scmp.ge.s32.totalorder %s25_s15, 2  ;;  %p156_p2 = scmp.lt.s32.totalorder %s726_s14, 3 }
   0x5   : > { %s886_s15 = smov (%p27_p1, %s25_s15), 0  ;;  %p157_p3 = pnand %p560_p0, %p156_p2 }
   0x6   : > { %p186_p4 = scmp.lt.s32.totalorder (!%p157_p3), %s718_s12, 1 }
   0x7   : > { %160 = sbr.rel (%p157_p3) target bundleno = 197 (0xc5), region = 32 }
   0xc   : > { %v233_v0 = vld [vmem:[%s881_s2 + $0x10] sm:$0xff]  ;;  %v231_v1 = vld [vmem:[%s881_s2] sm:$0xff]  ;;  %v728_v2 = vmov 0   ;;  %s888_s12 = smov (!%p186_p4, %s718_s12), 1  ;;  %v234_v9 = vld [vmem:[%s881_s2 + $0x18] sm:$0xff]  ;;  %vm367_vm0 = vcmask 523264  }
   0xd   : > { %702 = vset.pattern.permute.xlu1 %v728_v2  ;;  %701 = vset.pattern.permute.xlu0 %v728_v2  ;;  %v235_v3 = vld [vmem:[%s881_s2 + $0x20] sm:$0xff]  ;;  %s607_s22 = sshll.u32 %s888_s12, 6  ;;  %v232_v10 = vld [vmem:[%s881_s2 + $0x8] sm:$0xff]  ;;  %v238_v18 = vld [vmem:[%s881_s2 + $0x38] sm:$0xff] }
   0xe   : > { %259 = vperm.xlu1 %702, %v233_v0   ;;  %249 = vperm.xlu0 %701, %v231_v1   ;;  %s193_s25 = scalar_lea.vmem %s879_s0, %s607_s22  ;;  %v236_v12 = vld [vmem:[%s881_s2 + $0x28] sm:$0xff]  ;;  %v237_v19 = vld [vmem:[%s881_s2 + $0x30] sm:$0xff]  ;;  %v239_v21 = vld [vmem:[%s881_s2 + $0x40] sm:$0xff]  ;;  %s860_s26 = scalar_lea.vmem %s882_s3, %s607_s22 }
   0xf   : > { %703 = vset.pattern.permute.xlu2 %v728_v2  ;;  %v209_v4 = vld [vmem:[%s193_s25 + $0x30] sm:$0xff]  ;;  %v210_v5 = vld [vmem:[%s193_s25 + $0x38] sm:$0xff]  ;;  %v207_v6 = vld [vmem:[%s193_s25 + $0x20] sm:$0xff] }
  0x10   : > { %269 = vperm.xlu2 %703, %v235_v3   ;;  %v214_v7 = vpack.c.bf16 %v210_v5, %v209_v4  ;;  %v208_v8 = vld [vmem:[%s193_s25 + $0x28] sm:$0xff]  ;;  %v205_v13 = vld [vmem:[%s193_s25 + $0x10] sm:$0xff]  ;;  %v206_v14 = vld [vmem:[%s193_s25 + $0x18] sm:$0xff] }
  0x11   : > { %v213_v11 = vpack.c.bf16 %v208_v8, %v207_v6  ;;  %v212_v15 = vpack.c.bf16 %v206_v14, %v205_v13  ;;  %v203_v16 = vld [vmem:[%s193_s25] sm:$0xff]  ;;  %v204_v17 = vld [vmem:[%s193_s25 + $0x8] sm:$0xff]  ;;  %v611_v23 = vld [vmem:[%s880_s1 + $0x10] sm:$0xff] }
  0x12   : > { %396 = vmatpush.bf16.msra.mxu0 %v214_v7  ;;  %664 = vmatpush.bf16.msra.mxu1 %v214_v7  ;;  %v211_v20 = vpack.c.bf16 %v204_v17, %v203_v16  ;;  %v609_v22 = vld [vmem:[%s880_s1] sm:$0xff]  ;;  %v615_v25 = vld [vmem:[%s880_s1 + $0x30] sm:$0xff]  ;;  %v240_v27 = vld [vmem:[%s881_s2 + $0x48] sm:$0xff] }
  0x13   : > { %665 = vmatpush.bf16.msra.mxu2 %v214_v7  ;;  %666 = vmatpush.bf16.msra.mxu3 %v214_v7  ;;  %v613_v24 = vld [vmem:[%s880_s1 + $0x20] sm:$0xff]  ;;  %v241_v26 = vld [vmem:[%s881_s2 + $0x50] sm:$0xff]  ;;  %v242_v28 = vld [vmem:[%s881_s2 + $0x58] sm:$0xff] }
  0x14   : > { %v244_v29 = vld [vmem:[%s881_s2 + $0x68] sm:$0xff]  ;;  %v243_v30 = vld [vmem:[%s881_s2 + $0x60] sm:$0xff]  ;;  %v245_v31 = vld [vmem:[%s881_s2 + $0x70] sm:$0xff] }
  0x15   : > { %v610_v32 = vld [vmem:[%s880_s1 + $0x8] sm:$0xff]  ;;  %v612_v33 = vld [vmem:[%s880_s1 + $0x18] sm:$0xff] }
  0x16   : > { %264 = vperm.xlu1 %702, %v234_v9   ;;  %254 = vperm.xlu0 %701, %v232_v10   ;;  %v614_v34 = vld [vmem:[%s880_s1 + $0x28] sm:$0xff]  ;;  %v616_v35 = vld [vmem:[%s880_s1 + $0x38] sm:$0xff] }
  0x17   : > { %397 = vmatpush.bf16.msra.mxu0 %v213_v11  ;;  %667 = vmatpush.bf16.msra.mxu1 %v213_v11  ;;  %v246_v36 = vld [vmem:[%s881_s2 + $0x78] sm:$0xff] }
  0x18   : > { %274 = vperm.xlu2 %703, %v236_v12   ;;  %668 = vmatpush.bf16.msra.mxu2 %v213_v11 }
  0x19   : > { %669 = vmatpush.bf16.msra.mxu3 %v213_v11 }
  0x1b   : > { %398 = vmatpush.bf16.msra.mxu0 %v212_v15  ;;  %670 = vmatpush.bf16.msra.mxu1 %v212_v15 }
  0x1c   : > { %671 = vmatpush.bf16.msra.mxu2 %v212_v15 }
  0x1d   : > { %672 = vmatpush.bf16.msra.mxu3 %v212_v15 }
  0x1e   : > { %284 = vperm.xlu1 %702, %v238_v18   ;;  %279 = vperm.xlu0 %701, %v237_v19  }
  0x1f   : > { %399 = vmatpush.bf16.msra.mxu0 %v211_v20  ;;  %673 = vmatpush.bf16.msra.mxu1 %v211_v20 }
  0x20   : > { %289 = vperm.xlu2 %703, %v239_v21   ;;  %674 = vmatpush.bf16.msra.mxu2 %v211_v20 }
  0x21   : > { %675 = vmatpush.bf16.msra.mxu3 %v211_v20 }
  0x22   : > { %597 = vmatmul.msk.bf16.vlgmr.msra.gmra.mxu0 %vm367_vm0, %v609_v22  ;;  %599 = vmatmul.msk.bf16.vlgmr.msra.gmra.mxu1 %vm367_vm0, %v611_v23 }
  0x23   : > { %601 = vmatmul.msk.bf16.vlgmr.msra.gmra.mxu2 %vm367_vm0, %v613_v24 }
  0x24   : > { %603 = vmatmul.msk.bf16.vlgmr.msra.gmra.mxu3 %vm367_vm0, %v615_v25 }
  0x26   : > { %299 = vperm.xlu1 %702, %v241_v26   ;;  %294 = vperm.xlu0 %701, %v240_v27  }
  0x28   : > { %304 = vperm.xlu2 %703, %v242_v28  }
  0x2e   : > { %314 = vperm.xlu1 %702, %v244_v29   ;;  %309 = vperm.xlu0 %701, %v243_v30  }
  0x30   : > { %319 = vperm.xlu2 %703, %v245_v31  }
  0x32   : > { %598 = vmatmul.msk.bf16.gmra.mxu0 %vm367_vm0, %v610_v32  ;;  %600 = vmatmul.msk.bf16.gmra.mxu1 %vm367_vm0, %v612_v33 }
  0x33   : > { %602 = vmatmul.msk.bf16.gmra.mxu2 %vm367_vm0, %v614_v34 }
  0x34   : > { %604 = vmatmul.msk.bf16.gmra.mxu3 %vm367_vm0, %v616_v35 }
  0x36   : > { %324 = vperm.xlu0 %701, %v246_v36  }
  0x6a   : > { %v270_v41 = vpop.permute.xlu2 %269 }
  0x72   : > { %v275_v44 = vpop.permute.xlu2 %274 }
  0x7a   : > { %v290_v53 = vpop.permute.xlu2 %289 }
  0x80   : > { %v260_v37 = vpop.permute.xlu1 %259  ;;  %v250_v38 = vpop.permute.xlu0 %249 }
  0x82   : > { %v305_v8 = vpop.permute.xlu2 %304 }
  0x88   : > { %v265_v39 = vpop.permute.xlu1 %264  ;;  %v255_v40 = vpop.permute.xlu0 %254 }
  0x8a   : > { %v320_v19 = vpop.permute.xlu2 %319 }
  0x90   : > { %v285_v42 = vpop.permute.xlu1 %284  ;;  %v280_v43 = vpop.permute.xlu0 %279 }
  0x98   : > { %v300_v47 = vpop.permute.xlu1 %299  ;;  %v295_v48 = vpop.permute.xlu0 %294 }
  0x9f   : > { %v401_v45 = vpop.f32.mrf.mxu0  ;;  %v411_v46 = vpop.f32.mrf.mxu1 }
  0xa0   : > { %v402_v54 = vadd.f32 %v401_v45, %v250_v38  ;;  %v412_v55 = vadd.f32 %v411_v46, %v270_v41  ;;  %v315_v60 = vpop.permute.xlu1 %314  ;;  %v310_v61 = vpop.permute.xlu0 %309 }
  0xa6   : > { %v421_v49 = vpop.f32.mrf.mxu2 }
  0xa7   : > { %v431_v50 = vpop.f32.mrf.mxu3  ;;  %v403_v51 = vpop.f32.mrf.mxu0  ;;  %v422_v0 = vadd.f32 %v421_v49, %v290_v53 }
  0xa8   : > { %v413_v52 = vpop.f32.mrf.mxu1  ;;  %v404_v56 = vadd.f32 %v403_v51, %v255_v40  ;;  %v432_v1 = vadd.f32 %v431_v50, %v310_v61  ;;  %v325_v20 = vpop.permute.xlu0 %324 }
  0xa9   : > { %v414_v57 = vadd.f32 %v413_v52, %v275_v44 }
  0xaa   : > { %v620_v58 = vpack.c.bf16 %v404_v56, %v402_v54 }
  0xab   : > { %v630_v59 = vpack.c.bf16 %v414_v57, %v412_v55 }
  0xac   : > { %621 = vst [vmem:[%s860_s26] sm:$0xff] %v620_v58  }
  0xad   : > { %658 = vst [vmem:[%s860_s26 + $0x10] sm:$0xff] %v630_v59  }
  0xae   : > { %v423_v62 = vpop.f32.mrf.mxu2 }
  0xaf   : > { %v433_v63 = vpop.f32.mrf.mxu3  ;;  %v424_v2 = vadd.f32 %v423_v62, %v295_v48  ;;  %v406_v4 = vpop.f32.mrf.mxu0 }
  0xb0   : > { %v434_v3 = vadd.f32 %v433_v63, %v315_v60  ;;  %v416_v5 = vpop.f32.mrf.mxu1  ;;  %v407_v13 = vadd.f32 %v406_v4, %v260_v37 }
  0xb1   : > { %v640_v6 = vpack.c.bf16 %v424_v2, %v422_v0  ;;  %v417_v14 = vadd.f32 %v416_v5, %v280_v43 }
  0xb2   : > { %v650_v7 = vpack.c.bf16 %v434_v3, %v432_v1 }
  0xb3   : > { %660 = vst [vmem:[%s860_s26 + $0x20] sm:$0xff] %v640_v6  }
  0xb4   : > { %662 = vst [vmem:[%s860_s26 + $0x30] sm:$0xff] %v650_v7  }
  0xb6   : > { %v426_v9 = vpop.f32.mrf.mxu2 }
  0xb7   : > { %v436_v10 = vpop.f32.mrf.mxu3  ;;  %v408_v11 = vpop.f32.mrf.mxu0  ;;  %v427_v23 = vadd.f32 %v426_v9, %v300_v47 }
  0xb8   : > { %v418_v12 = vpop.f32.mrf.mxu1  ;;  %v409_v15 = vadd.f32 %v408_v11, %v265_v39  ;;  %v437_v24 = vadd.f32 %v436_v10, %v320_v19 }
  0xb9   : > { %v419_v16 = vadd.f32 %v418_v12, %v285_v42 }
  0xba   : > { %v625_v17 = vpack.c.bf16 %v409_v15, %v407_v13 }
  0xbb   : > { %v635_v18 = vpack.c.bf16 %v419_v16, %v417_v14 }
  0xbc   : > { %657 = vst [vmem:[%s860_s26 + $0x8] sm:$0xff] %v625_v17  }
  0xbd   : > { %659 = vst [vmem:[%s860_s26 + $0x18] sm:$0xff] %v635_v18  }
  0xbe   : > { %v428_v21 = vpop.f32.mrf.mxu2 }
  0xbf   : > { %v438_v22 = vpop.f32.mrf.mxu3  ;;  %v429_v25 = vadd.f32 %v428_v21, %v305_v8 }
  0xc0   : > { %v439_v26 = vadd.f32 %v438_v22, %v325_v20 }
  0xc1   : > { %v645_v27 = vpack.c.bf16 %v429_v25, %v427_v23 }
  0xc2   : > { %v655_v28 = vpack.c.bf16 %v439_v26, %v437_v24 }
  0xc3   : > { %661 = vst [vmem:[%s860_s26 + $0x28] sm:$0xff] %v645_v27  }
  0xc4   : > { %663 = vst [vmem:[%s860_s26 + $0x38] sm:$0xff] %v655_v28  }
  0xc5 PF: > { %s13_s14 = sadd.s32 1, %s726_s14   ;;  %s883_s12 = smov %s722_s13 }
  0xc6   : > { %p10_p5 = scmp.ge.s32.totalorder %s13_s14, 4   ;;  %s884_s13 = smov %s886_s15 }
  0xc8   :  { %12 = sbr.rel (!%p10_p5) target bundleno = 2 (0x2), region = 62 }

// kernel: detr_forward.3
= control target key start
LH: loop header
LB: loop body
LE: loop exit
PB: predicated region body
PF: predicated region fallthrough
CT: control target
= control target key end

     0   :  { %s1071_s30 = smov 0   ;;  %s1264_s0 = inlined_call_operand.vmem [shape: f32[64,128], index: 0, kind: input, shape index: {}]   ;;  %s1265_s1 = inlined_call_operand.vmem [shape: bf16[128,256], index: 1, kind: input, shape index: {}]   ;;  %s1266_s2 = inlined_call_operand.vmem [shape: f32[1,92], index: 2, kind: input, shape index: {}]   ;;  %s1267_s3 = inlined_call_operand.vmem [shape: f32[1,128], index: 3, kind: input, shape index: {}]   ;;  %s1268_s4 = inlined_call_operand.vmem [shape: bf16[128,128], index: 4, kind: input, shape index: {}]   ;;  %s1269_s5 = inlined_call_operand.vmem [shape: f32[1,128], index: 5, kind: input, shape index: {}]   ;;  %s1270_s6 = inlined_call_operand.vmem [shape: bf16[128,4], index: 6, kind: input, shape index: {}]   ;;  %s1271_s7 = inlined_call_operand.vmem [shape: f32[1,4], index: 7, kind: input, shape index: {}]   ;;  %s1272_s8 = inlined_call_operand.vmem [shape: f32[64,92], index: 8, kind: output, shape index: {0}]   ;;  %s1273_s9 = inlined_call_operand.vmem [shape: f32[64,4], index: 9, kind: output, shape index: {1}]  }
   0x1 LB: > { %s812_s10 = sadd.s32 4294967295, %s1019_s30   ;;  %p816_p0 = scmp.ge.s32.totalorder %s1019_s30, 1  ;;  %s1019_s30 = sphi %s1071_s30, %s20_s30  }
   0x2   : > { %p291_p1 = scmp.lt.s32.totalorder %s1019_s30, 3 }
   0x4   : > { %p292_p2 = pnand %p816_p0, %p291_p1 }
   0x5   : > { %s817_s27 = sshll.u32 (!%p292_p2), %s812_s10, 2 }
   0x6   : > { %295 = sbr.rel (%p292_p2) target bundleno = 510 (0x1fe), region = 52  ;;  %p333_p3 = scmp.lt.s32.totalorder (!%p292_p2), %s817_s27, 7 }
   0xb   : > { %v967_v0 = vld [vmem:[%s1265_s1 + $0x74] sm:$0xf]  ;;  %v883_v1 = vld [vmem:[%s1265_s1 + $0x78] sm:$0xf0]  ;;  %v965_v2 = vld [vmem:[%s1265_s1 + $0x64] sm:$0xf] }
   0xc   : > { %v886_v3 = vor.u32 %v967_v0, %v883_v1  ;;  %v875_v4 = vld [vmem:[%s1265_s1 + $0x68] sm:$0xf0]  ;;  %v963_v6 = vld [vmem:[%s1265_s1 + $0x54] sm:$0xf]  ;;  %v867_v7 = vld [vmem:[%s1265_s1 + $0x58] sm:$0xf0] }
   0xd   : > { %v878_v5 = vor.u32 %v965_v2, %v875_v4  ;;  %v870_v8 = vor.u32 %v963_v6, %v867_v7  ;;  %v961_v9 = vld [vmem:[%s1265_s1 + $0x44] sm:$0xf]  ;;  %v859_v10 = vld [vmem:[%s1265_s1 + $0x48] sm:$0xf0]  ;;  %v959_v12 = vld [vmem:[%s1265_s1 + $0x34] sm:$0xf] }
   0xe   : > { %471 = vmatpush.bf16.msra.mxu1 %v886_v3  ;;  %v862_v11 = vor.u32 %v961_v9, %v859_v10  ;;  %v851_v13 = vld [vmem:[%s1265_s1 + $0x38] sm:$0xf0]  ;;  %v957_v15 = vld [vmem:[%s1265_s1 + $0x24] sm:$0xf]  ;;  %v843_v16 = vld [vmem:[%s1265_s1 + $0x28] sm:$0xf0] }
   0xf   : > { %v854_v14 = vor.u32 %v959_v12, %v851_v13  ;;  %s1275_s27 = smov (!%p333_p3, %s817_s27), 7  ;;  %v976_v17 = vld [vmem:[%s1268_s4 + $0x38] sm:$0xff]  ;;  %v846_v18 = vor.u32 %v957_v15, %v843_v16  ;;  %v955_v19 = vld [vmem:[%s1265_s1 + $0x14] sm:$0xf]  ;;  %v953_v23 = vld [vmem:[%s1265_s1 + $0x4] sm:$0xf] }
  0x10   : > { %v835_v20 = vld [vmem:[%s1265_s1 + $0x18] sm:$0xf0]  ;;  %585 = vmatpush.bf16.msra.mxu2 %v976_v17  ;;  %v975_v21 = vld [vmem:[%s1268_s4 + $0x30] sm:$0xff]  ;;  %s1127_s24 = sshll.u32 %s1275_s27, 3  ;;  %v827_v24 = vld [vmem:[%s1265_s1 + $0x8] sm:$0xf0] }
  0x11   : > { %v838_v22 = vor.u32 %v955_v19, %v835_v20  ;;  %s336_s13 = scalar_lea.vmem %s1264_s0, %s1127_s24  ;;  %v974_v25 = vld [vmem:[%s1268_s4 + $0x28] sm:$0xff]  ;;  %v830_v26 = vor.u32 %v953_v23, %v827_v24  ;;  %v973_v29 = vld [vmem:[%s1268_s4 + $0x20] sm:$0xff]  ;;  %v972_v34 = vld [vmem:[%s1268_s4 + $0x18] sm:$0xff]  ;;  %s342_s23 = scalar_lea.vmem %s1272_s8, %s1127_s24  ;;  %vm498_vm0 = vcmask 752640   ;;  %vm717_vm1 = vcmask 31744  }
  0x12   : > { %472 = vmatpush.bf16.msra.mxu1 %v878_v5  ;;  %v350_v27 = vld [vmem:[%s336_s13] sm:$0xff]  ;;  %v351_v28 = vld [vmem:[%s336_s13 + $0x8] sm:$0xff]  ;;  %v352_v31 = vld [vmem:[%s336_s13 + $0x10] sm:$0xff]  ;;  %s348_s11 = scalar_lea.vmem %s1273_s9, %s1127_s24 }
  0x13   : > { %v1145_v30 = vpack.c.bf16 %v351_v28, %v350_v27  ;;  %v353_v32 = vld [vmem:[%s336_s13 + $0x18] sm:$0xff]  ;;  %v971_v35 = vld [vmem:[%s1268_s4 + $0x10] sm:$0xff]  ;;  %v970_v36 = vld [vmem:[%s1268_s4 + $0x8] sm:$0xff] }
  0x14   : > { %586 = vmatpush.bf16.msra.mxu2 %v975_v21  ;;  %v1148_v33 = vpack.c.bf16 %v353_v32, %v352_v31  ;;  %v969_v37 = vld [vmem:[%s1268_s4] sm:$0xff]  ;;  %v984_v38 = vld [vmem:[%s1270_s6 + $0x38] sm:$0xff]  ;;  %v983_v40 = vld [vmem:[%s1270_s6 + $0x30] sm:$0xff] }
  0x15   : > { %678 = vmatpush.bf16.msra.mxu3 %v984_v38  ;;  %v993_v41 = vld [vmem:[%s1267_s3] ss:$0 sm:$0xff]  ;;  %v982_v42 = vld [vmem:[%s1270_s6 + $0x28] sm:$0xff]  ;;  %v980_v57 = vld [vmem:[%s1270_s6 + $0x18] sm:$0xff] }
  0x16   : > { %473 = vmatpush.bf16.msra.mxu1 %v870_v8  ;;  %v981_v46 = vld [vmem:[%s1270_s6 + $0x20] sm:$0xff]  ;;  %v881_v58 = vld [vmem:[%s1265_s1 + $0x70] sm:$0xf]  ;;  %v968_v59 = vld [vmem:[%s1265_s1 + $0x74] sm:$0xf0] }
  0x17   : > { %v882_v60 = vor.u32 %v968_v59, %v881_v58  ;;  %v979_v61 = vld [vmem:[%s1270_s6 + $0x10] sm:$0xff]  ;;  %v873_v62 = vld [vmem:[%s1265_s1 + $0x60] sm:$0xf]  ;;  %v966_v63 = vld [vmem:[%s1265_s1 + $0x64] sm:$0xf0] }
  0x18   : > { %587 = vmatpush.bf16.msra.mxu2 %v974_v25  ;;  %v874_v0 = vor.u32 %v966_v63, %v873_v62  ;;  %v978_v1 = vld [vmem:[%s1270_s6 + $0x8] sm:$0xff]  ;;  %v865_v2 = vld [vmem:[%s1265_s1 + $0x50] sm:$0xf]  ;;  %v964_v3 = vld [vmem:[%s1265_s1 + $0x54] sm:$0xf0] }
  0x19   : > { %679 = vmatpush.bf16.msra.mxu3 %v983_v40  ;;  %452 = vmatpush.bf16.msra.mxu0 %v882_v60  ;;  %v866_v4 = vor.u32 %v964_v3, %v865_v2  ;;  %v977_v5 = vld [vmem:[%s1270_s6] sm:$0xff]  ;;  %v962_v7 = vld [vmem:[%s1265_s1 + $0x44] sm:$0xf0]  ;;  %v849_v9 = vld [vmem:[%s1265_s1 + $0x30] sm:$0xf] }
  0x1a   : > { %474 = vmatpush.bf16.msra.mxu1 %v862_v11  ;;  %v857_v6 = vld [vmem:[%s1265_s1 + $0x40] sm:$0xf]  ;;  %v960_v10 = vld [vmem:[%s1265_s1 + $0x34] sm:$0xf0]  ;;  %v958_v13 = vld [vmem:[%s1265_s1 + $0x24] sm:$0xf0] }
  0x1b   : > { %v858_v8 = vor.u32 %v962_v7, %v857_v6  ;;  %v850_v11 = vor.u32 %v960_v10, %v849_v9  ;;  %v841_v12 = vld [vmem:[%s1265_s1 + $0x20] sm:$0xf]  ;;  %v833_v15 = vld [vmem:[%s1265_s1 + $0x10] sm:$0xf]  ;;  %v956_v16 = vld [vmem:[%s1265_s1 + $0x14] sm:$0xf0] }
  0x1c   : > { %588 = vmatpush.bf16.msra.mxu2 %v973_v29  ;;  %v834_v17 = vor.u32 %v956_v16, %v833_v15  ;;  %v954_v19 = vld [vmem:[%s1265_s1 + $0x4] sm:$0xf0]  ;;  %v996_v38 = vld [vmem:[%s1266_s2] ss:$0 sm:$0xff] }
  0x1d   : > { %680 = vmatpush.bf16.msra.mxu3 %v982_v42  ;;  %453 = vmatpush.bf16.msra.mxu0 %v874_v0  ;;  %v995_v42 = vld [vmem:[%s1271_s7] ss:$0 sm:$0xff] }
  0x1e   : > { %475 = vmatpush.bf16.msra.mxu1 %v854_v14  ;;  %v842_v14 = vor.u32 %v958_v13, %v841_v12 }
  0x20   : > { %589 = vmatpush.bf16.msra.mxu2 %v972_v34 }
  0x21   : > { %681 = vmatpush.bf16.msra.mxu3 %v981_v46  ;;  %454 = vmatpush.bf16.msra.mxu0 %v866_v4 }
  0x22   : > { %476 = vmatpush.bf16.msra.mxu1 %v846_v18  ;;  %v825_v18 = vld [vmem:[%s1265_s1] sm:$0xf] }
  0x23   : > { %v826_v20 = vor.u32 %v954_v19, %v825_v18 }
  0x24   : > { %590 = vmatpush.bf16.msra.mxu2 %v971_v35 }
  0x25   : > { %682 = vmatpush.bf16.msra.mxu3 %v980_v57  ;;  %455 = vmatpush.bf16.msra.mxu0 %v858_v8 }
  0x26   : > { %477 = vmatpush.bf16.msra.mxu1 %v838_v22  ;;  %v994_v22 = vld [vmem:[%s1269_s5] ss:$0 sm:$0xff] }
  0x28   : > { %591 = vmatpush.bf16.msra.mxu2 %v970_v36 }
  0x29   : > { %683 = vmatpush.bf16.msra.mxu3 %v979_v61  ;;  %456 = vmatpush.bf16.msra.mxu0 %v850_v11 }
  0x2a   : > { %478 = vmatpush.bf16.msra.mxu1 %v830_v26 }
  0x2c   : > { %592 = vmatpush.bf16.msra.mxu2 %v969_v37 }
  0x2d   : > { %479 = vmatmul.bf16.vlgmr.msra.gmra.mxu1 %v1145_v30  ;;  %684 = vmatpush.bf16.msra.mxu3 %v978_v1 }
  0x2e   : > { %457 = vmatpush.bf16.msra.mxu0 %v842_v14 }
  0x31   : > { %685 = vmatpush.bf16.msra.mxu3 %v977_v5 }
  0x32   : > { %458 = vmatpush.bf16.msra.mxu0 %v834_v17 }
  0x36   : > { %459 = vmatpush.bf16.msra.mxu0 %v826_v20 }
  0x39   : > { %460 = vmatmul.bf16.vlgmr.msra.gmra.mxu0 %v1145_v30 }
  0x3d   : > { %484 = vmatmul.bf16.gmra.mxu1 %v1148_v33 }
  0x49   : > { %465 = vmatmul.bf16.gmra.mxu0 %v1148_v33 }
  0xaa   : > { %v480_v39 = vpop.f32.mrf.mxu1 }
  0xab   : > { %v507_v43 = vadd.f32 %v993_v41, %v480_v39 }
  0xad   : > { %v511_v47 = vmax.f32 %v507_v43, 0.0 }
  0xb2   : > { %v482_v44 = vpop.f32.mrf.mxu1 }
  0xb3   : > { %v508_v45 = vadd.f32 %v993_v41, %v482_v44 }
  0xb5   : > { %v512_v48 = vmax.f32 %v508_v45, 0.0 }
  0xb6   : > { %v461_v37 = vpop.f32.mrf.mxu0 }
  0xb7   : > { %v515_v49 = vpack.c.bf16 %v512_v48, %v511_v47  ;;  %v494_v39 = vadd.f32 %v996_v38, %v461_v37 }
  0xb9   : > { %593 = vmatmul.bf16.vlgmr.msra.gmra.mxu2 %v515_v49  ;;  %499 = vst.msk [vmem:[%s342_s23] sm:$0xff] %vm498_vm0, %v494_v39 }
  0xba   : > { %v485_v50 = vpop.f32.mrf.mxu1 }
  0xbb   : > { %v509_v51 = vadd.f32 %v993_v41, %v485_v50 }
  0xbd   : > { %v513_v54 = vmax.f32 %v509_v51, 0.0 }
  0xbe   : > { %v463_v40 = vpop.f32.mrf.mxu0 }
  0xbf   : > { %v495_v33 = vadd.f32 %v996_v38, %v463_v40 }
  0xc1   : > { %500 = vst.msk [vmem:[%s342_s23 + $0x8] sm:$0xff] %vm498_vm0, %v495_v33 }
  0xc2   : > { %v487_v52 = vpop.f32.mrf.mxu1 }
  0xc3   : > { %v510_v53 = vadd.f32 %v993_v41, %v487_v52 }
  0xc5   : > { %v514_v55 = vmax.f32 %v510_v53, 0.0 }
  0xc6   : > { %v466_v41 = vpop.f32.mrf.mxu0 }
  0xc7   : > { %v516_v56 = vpack.c.bf16 %v514_v55, %v513_v54  ;;  %v496_v46 = vadd.f32 %v996_v38, %v466_v41 }
  0xc9   : > { %598 = vmatmul.bf16.gmra.mxu2 %v516_v56  ;;  %501 = vst.msk [vmem:[%s342_s23 + $0x10] sm:$0xff] %vm498_vm0, %v496_v46 }
  0xce   : > { %v468_v47 = vpop.f32.mrf.mxu0 }
  0xcf   : > { %v497_v49 = vadd.f32 %v996_v38, %v468_v47 }
  0xd1   : > { %502 = vst.msk [vmem:[%s342_s23 + $0x18] sm:$0xff] %vm498_vm0, %v497_v49 }
 0x13c   : > { %v594_v21 = vpop.f32.mrf.mxu2 }
 0x13d   : > { %v595_v23 = vadd.f32 %v994_v22, %v594_v21 }
 0x13f   : > { %v604_v26 = vmax.f32 %v595_v23, 0.0 }
 0x144   : > { %v596_v24 = vpop.f32.mrf.mxu2 }
 0x145   : > { %v597_v25 = vadd.f32 %v994_v22, %v596_v24 }
 0x147   : > { %v605_v27 = vmax.f32 %v597_v25, 0.0 }
 0x149   : > { %v608_v28 = vpack.c.bf16 %v605_v27, %v604_v26 }
 0x14b   : > { %686 = vmatmul.bf16.vlgmr.msra.gmra.mxu3 %v608_v28 }
 0x14c   : > { %v599_v29 = vpop.f32.mrf.mxu2 }
 0x14d   : > { %v600_v31 = vadd.f32 %v994_v22, %v599_v29 }
 0x14f   : > { %v606_v35 = vmax.f32 %v600_v31, 0.0 }
 0x154   : > { %v601_v32 = vpop.f32.mrf.mxu2 }
 0x155   : > { %v602_v34 = vadd.f32 %v994_v22, %v601_v32 }
 0x157   : > { %v607_v30 = vmax.f32 %v602_v34, 0.0 }
 0x159   : > { %v609_v36 = vpack.c.bf16 %v607_v30, %v606_v35 }
 0x15b   : > { %691 = vmatmul.bf16.gmra.mxu3 %v609_v36 }
 0x1ce   : > { %v687_v43 = vpop.f32.mrf.mxu3 }
 0x1cf   : > { %v688_v44 = vadd.f32 %v995_v42, %v687_v43 }
 0x1d1   : > { %v697_v45 = vsub.f32 0.0, %v688_v44 }
 0x1d3   : > { %v701_v48 = vmul.f32 1.442695, %v697_v45 }
 0x1d5   : > { %997 = vpow2.f32 %v701_v48 }
 0x1d6   : > { %v689_v50 = vpop.f32.mrf.mxu3 }
 0x1d7   : > { %v690_v51 = vadd.f32 %v995_v42, %v689_v50 }
 0x1d9   : > { %v698_v52 = vsub.f32 0.0, %v690_v51 }
 0x1db   : > { %v998_v53 = vpop.eup %997  ;;  %v703_v54 = vmul.f32 1.442695, %v698_v52 }
 0x1dc   : > { %v709_v55 = vadd.f32 1.0, %v998_v53 }
 0x1dd   : > { %999 = vpow2.f32 %v703_v54 }
 0x1de   : > { %1001 = vrcp.f32 %v709_v55  ;;  %v692_v56 = vpop.f32.mrf.mxu3 }
 0x1df   : > { %v693_v57 = vadd.f32 %v995_v42, %v692_v56 }
 0x1e1   : > { %v699_v58 = vsub.f32 0.0, %v693_v57 }
 0x1e3   : > { %v1000_v59 = vpop.eup %999  ;;  %v705_v60 = vmul.f32 1.442695, %v699_v58 }
 0x1e4   : > { %v1002_v61 = vpop.eup %1001  ;;  %v710_v62 = vadd.f32 1.0, %v1000_v59 }
 0x1e5   : > { %718 = vst.msk [vmem:[%s348_s11] sm:$0xff] %vm717_vm1, %v1002_v61  ;;  %1003 = vpow2.f32 %v705_v60 }
 0x1e6   : > { %1005 = vrcp.f32 %v710_v62  ;;  %v694_v63 = vpop.f32.mrf.mxu3 }
 0x1e7   : > { %v695_v0 = vadd.f32 %v995_v42, %v694_v63 }
 0x1e9   : > { %v700_v1 = vsub.f32 0.0, %v695_v0 }
 0x1eb   : > { %v1004_v2 = vpop.eup %1003  ;;  %v707_v3 = vmul.f32 1.442695, %v700_v1 }
 0x1ec   : > { %v1006_v4 = vpop.eup %1005  ;;  %v711_v5 = vadd.f32 1.0, %v1004_v2 }
 0x1ed   : > { %719 = vst.msk [vmem:[%s348_s11 + $0x8] sm:$0xff] %vm717_vm1, %v1006_v4  ;;  %1007 = vpow2.f32 %v707_v3 }
 0x1ee   : > { %1009 = vrcp.f32 %v711_v5 }
 0x1f3   : > { %v1008_v6 = vpop.eup %1007 }
 0x1f4   : > { %v1010_v7 = vpop.eup %1009  ;;  %v712_v8 = vadd.f32 1.0, %v1008_v6 }
 0x1f5   : > { %720 = vst.msk [vmem:[%s348_s11 + $0x10] sm:$0xff] %vm717_vm1, %v1010_v7 }
 0x1f6   : > { %1011 = vrcp.f32 %v712_v8 }
 0x1fc   : > { %v1012_v9 = vpop.eup %1011 }
 0x1fd   : > { %721 = vst.msk [vmem:[%s348_s11 + $0x18] sm:$0xff] %vm717_vm1, %v1012_v9 }
 0x1fe PF: > { %s20_s30 = sadd.s32 1, %s1019_s30  }
 0x1ff   : > { %p17_p4 = scmp.ge.s32.totalorder %s20_s30, 4  }
 0x201   :  { %19 = sbr.rel (!%p17_p4) target bundleno = 1 (0x1), region = 94 }

</bundles_post_ra>
